<compile_context>
chip_gen: v7x
topology: tpu7x:2x2x1
jax: 0.10.0
libtpu: 0.0.40
codegen_flags: <defaults>
</compile_context>

<pallas_src>
import numpy as np
import jax
import jax.numpy as jnp
from jax import lax
from jax.experimental import pallas as pl
from jax.experimental.pallas import tpu as pltpu

# ---- config mirroring `cf` in the original source ----
ACTIVATE_F = "relu"        # cf.activate_f
NODE_COMBINE = "max"       # cf.node_combine
AGGREGATE_DIM = 32         # cf.aggregate_dim
# NOTE: cf.is_avg_weighted_RvNN branch is dead code in the original module
# (children weights are always <= 1, so `max(children_weight) > 1` never holds).

LANE = 128                 # pad feature dims to the 128-lane vreg width


def _round_up(n, m):
    return ((n + m - 1) // m) * m


def convert_rebuild_tree_to_RvNN_format(root_node, tree, tree_with_label, start_index):
    children = tree[root_node]
    for r in children:
        tree_with_label.append([r + start_index])
        if r in tree.keys():
            convert_rebuild_tree_to_RvNN_format(r, tree, tree_with_label[-1], start_index)


# ---------------- fused wave-synchronous RvNN kernel ----------------

def _make_wave_kernel(WAVE_R, E_MAX):
    """One grid step per wave (tree level), leaves first.

    Per wave:
      1. zero a (WAVE_R, 128) child-sum buffer and accumulate this wave's
         children (already-computed rows of the resident results table) via the
         wave's edge list (lax.fori_loop over the actual edge count);
      2. enc  = relu(pool @ W_enc + b_enc) * valid          (fused sub-tree enc)
         out  = enc @ W_c + b_c + csum @ W_sum + n_children * b_sum
      3. store the wave's rows into the resident results table (kernel output).
    """

    def kernel(ecnt_ref, epar_ref, echl_ref,                     # scalar prefetch (SMEM)
               poolg_ref, valid_ref, nsl_ref,                    # streamed per wave (VMEM)
               wenc_ref, benc_ref, wc_ref, bc_ref, ws_ref, bs_ref,  # resident params
               res_ref,                                          # output: results table
               csum_ref):                                        # scratch: child sums
        w = pl.program_id(0)

        # ---- accumulate child results (earlier waves) via this wave's edges ----
        csum_ref[...] = jnp.zeros_like(csum_ref)
        base = w * E_MAX

        def edge_body(e, carry):
            p = epar_ref[base + e]          # parent slot within this wave
            c = echl_ref[base + e]          # child row in the global results table
            csum_ref[pl.ds(p, 1), :] += res_ref[pl.ds(c, 1), :]
            return carry

        lax.fori_loop(0, ecnt_ref[w], edge_body, 0)

        # ---- fused sub-tree encoder + W_c + W_sum: wide matmuls over the wave ----
        enc = jnp.maximum(
            jnp.dot(poolg_ref[0], wenc_ref[...], preferred_element_type=jnp.float32)
            + benc_ref[...], 0.0) * valid_ref[0]
        out = (jnp.dot(enc, wc_ref[...], preferred_element_type=jnp.float32)
               + bc_ref[...]
               + jnp.dot(csum_ref[...], ws_ref[...], preferred_element_type=jnp.float32)
               + nsl_ref[0] * bs_ref[...])

        row0 = pl.multiple_of(w * WAVE_R, 8)
        res_ref[pl.ds(row0, WAVE_R), :] = out

    return kernel


# ---------------- the encoder ----------------

class BatchASTEncoderPallas:
    def __init__(self, embedding_dim, hidden_dim, vocab_size, encode_dim,
                 batch_size, key):
        del hidden_dim  # unused by the forward pass (as in the original)
        self.batch_size = batch_size
        self.embedding_dim = embedding_dim
        self.encode_dim = encode_dim
        self.encode_dim2 = AGGREGATE_DIM
        self.emb_pad = _round_up(embedding_dim, LANE)
        self.enc_pad_dim = _round_up(encode_dim, LANE)
        self.agg_pad_dim = _round_up(AGGREGATE_DIM, LANE)

        k = jax.random.split(key, 7)
        scale = 0.1
        self.emb_table = scale * jax.random.normal(
            k[0], (vocab_size, embedding_dim), jnp.float32)
        # TODO(synk): WeightedBatchSubTreeEncoder source is not provided; it is
        # synthesized deterministically as mean-pooled token embeddings ->
        # Linear(embedding_dim, encode_dim) -> relu (fused into the tree kernel).
        w_enc = scale * jax.random.normal(k[1], (embedding_dim, encode_dim), jnp.float32)
        b_enc = scale * jax.random.normal(k[2], (encode_dim,), jnp.float32)
        w_c = scale * jax.random.normal(k[3], (encode_dim, AGGREGATE_DIM), jnp.float32)
        b_c = scale * jax.random.normal(k[4], (AGGREGATE_DIM,), jnp.float32)
        w_sum = scale * jax.random.normal(k[5], (AGGREGATE_DIM, AGGREGATE_DIM), jnp.float32)
        b_sum = scale * jax.random.normal(k[6], (AGGREGATE_DIM,), jnp.float32)

        # un-padded numpy copies for the reference check
        self._np = dict(emb=np.asarray(self.emb_table),
                        w_enc=np.asarray(w_enc), b_enc=np.asarray(b_enc),
                        w_c=np.asarray(w_c), b_c=np.asarray(b_c),
                        w_sum=np.asarray(w_sum), b_sum=np.asarray(b_sum))

        # lane-dense (128-wide) zero-padded parameters: padding is exact
        self.w_enc_pad = jnp.zeros((self.emb_pad, self.enc_pad_dim), jnp.float32
                                   ).at[:embedding_dim, :encode_dim].set(w_enc)
        self.b_enc_pad = jnp.zeros((1, self.enc_pad_dim), jnp.float32
                                   ).at[0, :encode_dim].set(b_enc)
        self.w_c_pad = jnp.zeros((self.enc_pad_dim, self.agg_pad_dim), jnp.float32
                                 ).at[:encode_dim, :AGGREGATE_DIM].set(w_c)
        self.b_c_pad = jnp.zeros((1, self.agg_pad_dim), jnp.float32
                                 ).at[0, :AGGREGATE_DIM].set(b_c)
        self.w_sum_pad = jnp.zeros((self.agg_pad_dim, self.agg_pad_dim), jnp.float32
                                   ).at[:AGGREGATE_DIM, :AGGREGATE_DIM].set(w_sum)
        self.b_sum_pad = jnp.zeros((1, self.agg_pad_dim), jnp.float32
                                   ).at[0, :AGGREGATE_DIM].set(b_sum)

    # --- flatten the traverse_mul recursion into post-order call records ---
    def _flatten_calls(self, node, batch_index, records):
        size = len(node)
        if not size:
            return None
        index, current_node = [], []
        children_index, children = [], []
        for i in range(size):
            if node[i][0] != -1:
                index.append(i)
                current_node.append(node[i][0])
                temp = node[i][1:]
                for j in range(len(temp)):
                    if temp[j][0] != -1:
                        if len(children_index) <= j:
                            children_index.append([i])
                            children.append([temp[j]])
                        else:
                            children_index[j].append(i)
                            children[j].append(temp[j])
            else:
                batch_index[i] = -1
        child_entries = []
        for c in range(len(children)):
            sub_bi = [batch_index[i] for i in children_index[c]]
            cid = self._flatten_calls(children[c], sub_bi, records)
            if cid is not None:
                child_entries.append((cid, list(children_index[c])))
        gather = [-1] * size
        for pos, i in enumerate(index):
            gather[i] = current_node[pos]
        records.append(dict(size=size, gather=gather, children=child_entries,
                            b_index=list(batch_index)))
        return len(records) - 1

    # --- BatchASTEncoder.forward ---
    def forward(self, x, rebuild_x):
        B = self.batch_size
        lens = [len(item) for item in x]
        flat = []
        for i in range(B):
            flat.extend(x[i])
        n_sub = len(flat)

        # ---- sub-tree token pooling (vectorized gather + masked mean, XLA) ----
        t_max = max(len(t) for t in flat)
        ids = np.zeros((n_sub, t_max), np.int32)
        mask = np.zeros((n_sub, t_max), np.float32)
        for r, toks in enumerate(flat):
            ids[r, :len(toks)] = np.asarray(toks, np.int32)
            mask[r, :len(toks)] = 1.0
        emb = jnp.take(self.emb_table, jnp.asarray(ids), axis=0)
        maskj = jnp.asarray(mask)
        denom = jnp.maximum(maskj.sum(axis=1, keepdims=True), 1.0)
        pooled = (emb * maskj[:, :, None]).sum(axis=1) / denom          # (n_sub, emb)
        pooled_z = jnp.concatenate(
            [pooled, jnp.zeros((1, self.embedding_dim), jnp.float32)], axis=0)

        # ---- rebuild trees in RvNN format ----
        rebuild_trees = []
        start_index = 0
        for i in range(B):
            tree_with_label = [0 + start_index]
            convert_rebuild_tree_to_RvNN_format(0, rebuild_x[i], tree_with_label,
                                                start_index)
            start_index += lens[i]
            rebuild_trees.append(tree_with_label)

        # ---- flatten recursion and schedule into level-synchronous waves ----
        records = []
        self._flatten_calls(rebuild_trees, list(range(B)), records)
        L = len(records)

        depth = [0] * L                       # post-order => children before parents
        for k, rec in enumerate(records):
            d = 0
            for (cidx, _) in rec["children"]:
                d = max(d, depth[cidx] + 1)
            depth[k] = d
        num_waves = max(depth) + 1

        wave_rows = [0] * num_waves
        call_off = [0] * L
        for k, rec in enumerate(records):
            w = depth[k]
            call_off[k] = wave_rows[w]
            wave_rows[w] += rec["size"]
        WAVE_R = _round_up(max(max(wave_rows), 8), 8)
        R_pad = num_waves * WAVE_R

        # edge list per wave: (parent slot within wave, child global row)
        edges = [[] for _ in range(num_waves)]
        for k, rec in enumerate(records):
            w = depth[k]
            pbase = call_off[k]
            for (cidx, parents) in rec["children"]:
                cbase = depth[cidx] * WAVE_R + call_off[cidx]
                for m, prow in enumerate(parents):
                    edges[w].append((pbase + prow, cbase + m))
        E_MAX = max(1, max(len(e) for e in edges))

        gat = np.full((num_waves, WAVE_R), -1, np.int32)       # wave row -> sub-tree id
        val = np.zeros((num_waves, WAVE_R, 1), np.float32)     # 1.0 for live rows
        nsl = np.zeros((num_waves, WAVE_R, 1), np.float32)     # live child slots of call
        node_row = np.full((L, B), -1, np.int32)               # node_list gather indices
        for k, rec in enumerate(records):
            w, off = depth[k], call_off[k]
            nch = float(len(rec["children"]))
            for i in range(rec["size"]):
                g = rec["gather"][i]
                gat[w, off + i] = g
                val[w, off + i, 0] = 1.0 if g != -1 else 0.0
                nsl[w, off + i, 0] = nch
                b = rec["b_index"][i]
                if b != -1 and g != -1:
                    node_row[k, b] = w * WAVE_R + off + i

        ecnt = np.zeros((num_waves,), np.int32)
        epar = np.zeros((num_waves, E_MAX), np.int32)
        echl = np.zeros((num_waves, E_MAX), np.int32)
        for w in range(num_waves):
            ecnt[w] = len(edges[w])
            for e, (p, c) in enumerate(edges[w]):
                epar[w, e] = p
                echl[w, e] = c

        # ---- pre-gather pooled sub-tree embeddings per wave row (zero row for
        #      empty/pad slots -> no clamp+mask gather inside the kernel) ----
        gat_flat = gat.reshape(-1)
        gat_idx = jnp.asarray(np.where(gat_flat < 0, n_sub, gat_flat).astype(np.int32))
        gathered = jnp.take(pooled_z, gat_idx, axis=0)                  # (R_pad, emb)
        poolg = jnp.zeros((R_pad, self.emb_pad), jnp.float32
                          ).at[:, :self.embedding_dim].set(gathered
                          ).reshape(num_waves, WAVE_R, self.emb_pad)

        EP, CP, AP = self.emb_pad, self.enc_pad_dim, self.agg_pad_dim
        kernel = _make_wave_kernel(WAVE_R, E_MAX)

        need = 4 * (2 * R_pad * AP                       # resident results table
                    + 2 * WAVE_R * (EP + 2)              # double-buffered streamed inputs
                    + EP * CP + CP * AP + AP * AP        # resident weights
                    + CP + 2 * AP                        # biases
                    + WAVE_R * AP)                       # child-sum scratch
        vmem_limit = int(min(max(2 * need, 32 << 20), 48 << 20))

        res = pl.pallas_call(
            kernel,
            out_shape=jax.ShapeDtypeStruct((R_pad, AP), jnp.float32),
            grid_spec=pltpu.PrefetchScalarGridSpec(
                num_scalar_prefetch=3,
                grid=(num_waves,),
                in_specs=[
                    pl.BlockSpec((1, WAVE_R, EP), lambda w, *_: (w, 0, 0)),   # poolg
                    pl.BlockSpec((1, WAVE_R, 1), lambda w, *_: (w, 0, 0)),    # valid
                    pl.BlockSpec((1, WAVE_R, 1), lambda w, *_: (w, 0, 0)),    # n_children
                    pl.BlockSpec((EP, CP), lambda w, *_: (0, 0)),             # W_enc
                    pl.BlockSpec((1, CP), lambda w, *_: (0, 0)),              # b_enc
                    pl.BlockSpec((CP, AP), lambda w, *_: (0, 0)),             # W_c
                    pl.BlockSpec((1, AP), lambda w, *_: (0, 0)),              # b_c
                    pl.BlockSpec((AP, AP), lambda w, *_: (0, 0)),             # W_sum
                    pl.BlockSpec((1, AP), lambda w, *_: (0, 0)),              # b_sum
                ],
                # full-array block with a constant index map: the results table
                # stays resident in VMEM for all waves and is written to HBM once.
                out_specs=pl.BlockSpec((R_pad, AP), lambda w, *_: (0, 0)),
                scratch_shapes=[pltpu.VMEM((WAVE_R, AP), jnp.float32)]),
            compiler_params=pltpu.CompilerParams(
                dimension_semantics=("arbitrary",),
                vmem_limit_bytes=vmem_limit),
        )(jnp.asarray(ecnt), jnp.asarray(epar.reshape(-1)), jnp.asarray(echl.reshape(-1)),
          poolg, jnp.asarray(val), jnp.asarray(nsl),
          self.w_enc_pad, self.b_enc_pad, self.w_c_pad, self.b_c_pad,
          self.w_sum_pad, self.b_sum_pad)

        # ---- node_list assembly + pooled combine (tiny, XLA) ----
        flat_idx = jnp.asarray(node_row.reshape(-1))
        rows = jnp.take(res, jnp.maximum(flat_idx, 0), axis=0)
        rows = rows * (flat_idx >= 0).astype(jnp.float32)[:, None]
        rows = jnp.maximum(rows, 0.0) if ACTIVATE_F == "relu" else jnp.tanh(rows)
        node_stack = rows.reshape(L, B, AP)[:, :, :AGGREGATE_DIM]
        if NODE_COMBINE == "max":
            pooled_out = jnp.max(node_stack, axis=0)
        else:  # 'mean'
            pooled_out = jnp.mean(node_stack, axis=0)
        return node_stack, pooled_out

    # --- pure-numpy reference of the original PyTorch forward (for validation) ---
    def reference_forward(self, x, rebuild_x):
        p = self._np
        B = self.batch_size
        lens = [len(item) for item in x]
        flat = []
        for i in range(B):
            flat.extend(x[i])
        pooled = np.stack([p["emb"][np.asarray(t, np.int64)].mean(axis=0) for t in flat])
        encodes = np.maximum(pooled.astype(np.float32) @ p["w_enc"] + p["b_enc"], 0.0)

        rebuild_trees = []
        start_index = 0
        for i in range(B):
            tree_with_label = [0 + start_index]
            convert_rebuild_tree_to_RvNN_format(0, rebuild_x[i], tree_with_label,
                                                start_index)
            start_index += lens[i]
            rebuild_trees.append(tree_with_label)

        node_list = []

        def trav(node, batch_index):
            size = len(node)
            if not size:
                return None
            index, current_node, children_index, children = [], [], [], []
            for i in range(size):
                if node[i][0] != -1:
                    index.append(i)
                    current_node.append(node[i][0])
                    temp = node[i][1:]
                    for j in range(len(temp)):
                        if temp[j][0] != -1:
                            if len(children_index) <= j:
                                children_index.append([i])
                                children.append([temp[j]])
                            else:
                                children_index[j].append(i)
                                children[j].append(temp[j])
                else:
                    batch_index[i] = -1
            gathered = np.zeros((size, self.encode_dim), np.float32)
            gathered[np.asarray(index, np.int64)] = encodes[np.asarray(current_node, np.int64)]
            cur = gathered @ p["w_c"] + p["b_c"]
            for c in range(len(children)):
                sub_bi = [batch_index[i] for i in children_index[c]]
                tree = trav(children[c], sub_bi)
                if tree is not None:
                    scat = np.zeros((size, AGGREGATE_DIM), np.float32)
                    scat[np.asarray(children_index[c], np.int64)] = tree
                    cur = cur + scat @ p["w_sum"] + p["b_sum"]
            node = np.zeros((B, AGGREGATE_DIM), np.float32)
            b_in = np.asarray([bi for bi in batch_index if bi != -1], np.int64)
            node[b_in] = cur
            node_list.append(np.maximum(node, 0.0) if ACTIVATE_F == "relu"
                             else np.tanh(node))
            return cur

        trav(rebuild_trees, list(range(B)))
        stack = np.stack(node_list)
        pooled_out = stack.max(axis=0) if NODE_COMBINE == "max" else stack.mean(axis=0)
        return stack, pooled_out


if __name__ == "__main__":
    key = jax.random.PRNGKey(0)
    embedding_dim, hidden_dim, vocab_size = 16, 32, 50
    encode_dim, batch_size = 32, 2

    enc = BatchASTEncoderPallas(embedding_dim, hidden_dim, vocab_size,
                                encode_dim, batch_size, key)

    # x: per-batch-item list of sub-trees; each sub-tree is a list of token ids
    x = [
        [[1, 2, 3, 4], [5, 6, 7, 8], [9, 10, 11, 12]],                              # 3 sub-trees
        [[13, 14, 15, 16], [17, 18, 19, 20], [21, 22, 23, 24], [25, 26, 27, 28]],    # 4 sub-trees
    ]
    # rebuild_x: per-batch-item adjacency dict (node -> children), local ids
    rebuild_x = [
        {0: [1, 2]},
        {0: [1, 2], 1: [3]},
    ]

    node_stack, pooled = enc.forward(x, rebuild_x)
    jax.block_until_ready((node_stack, pooled))
    assert node_stack.shape[1:] == (batch_size, AGGREGATE_DIM)
    assert pooled.shape == (batch_size, AGGREGATE_DIM)

    ref_stack, ref_pool = enc.reference_forward(x, rebuild_x)
    np.testing.assert_allclose(np.asarray(node_stack), ref_stack, rtol=2e-3, atol=2e-3)
    np.testing.assert_allclose(np.asarray(pooled), ref_pool, rtol=2e-3, atol=2e-3)

    print("KERNEL_OK")
</pallas_src>

<mosaic_0001>
module attributes {stable_mosaic.version = 11 : i64} {
  func.func @kernel(%arg0: i32, %arg1: memref<3xi32, #tpu.memory_space<smem>>, %arg2: memref<12xi32, #tpu.memory_space<smem>>, %arg3: memref<12xi32, #tpu.memory_space<smem>>, %arg4: memref<1x8x128xf32, #tpu.memory_space<vmem>>, %arg5: memref<1x8x1xf32, #tpu.memory_space<vmem>>, %arg6: memref<1x8x1xf32, #tpu.memory_space<vmem>>, %arg7: memref<128x128xf32, #tpu.memory_space<vmem>>, %arg8: memref<1x128xf32, #tpu.memory_space<vmem>>, %arg9: memref<128x128xf32, #tpu.memory_space<vmem>>, %arg10: memref<1x128xf32, #tpu.memory_space<vmem>>, %arg11: memref<128x128xf32, #tpu.memory_space<vmem>>, %arg12: memref<1x128xf32, #tpu.memory_space<vmem>>, %arg13: memref<24x128xf32, #tpu.memory_space<vmem>>, %arg14: memref<8x128xf32, #tpu.memory_space<vmem>>) attributes {dimension_semantics = [#tpu.dimension_semantics<arbitrary>], iteration_bounds = array<i64: 3>, scalar_prefetch = 3 : i64, scratch_operands = 1 : i64, tpu.core_type = #tpu.core_type<tc>, window_params = [{transform_indices = @transform_0, window_bounds = array<i64: 1, 8, 128>}, {transform_indices = @transform_1, window_bounds = array<i64: 1, 8, 1>}, {transform_indices = @transform_2, window_bounds = array<i64: 1, 8, 1>}, {pipeline_mode = #tpu.pipeline_mode<synchronous>, transform_indices = @transform_3, window_bounds = array<i64: 128, 128>}, {pipeline_mode = #tpu.pipeline_mode<synchronous>, transform_indices = @transform_4, window_bounds = array<i64: 1, 128>}, {pipeline_mode = #tpu.pipeline_mode<synchronous>, transform_indices = @transform_5, window_bounds = array<i64: 128, 128>}, {pipeline_mode = #tpu.pipeline_mode<synchronous>, transform_indices = @transform_6, window_bounds = array<i64: 1, 128>}, {pipeline_mode = #tpu.pipeline_mode<synchronous>, transform_indices = @transform_7, window_bounds = array<i64: 128, 128>}, {pipeline_mode = #tpu.pipeline_mode<synchronous>, transform_indices = @transform_8, window_bounds = array<i64: 1, 128>}, {pipeline_mode = #tpu.pipeline_mode<synchronous>, transform_indices = @transform_9, window_bounds = array<i64: 24, 128>}]} {
    %cst = arith.constant 0.000000e+00 : f32
    %0 = vector.broadcast %cst : f32 to vector<8x128xf32>
    %c0 = arith.constant 0 : index
    %c0_0 = arith.constant 0 : index
    %1 = vector.load %arg14[%c0, %c0_0] : memref<8x128xf32, #tpu.memory_space<vmem>>, vector<8x128xf32>
    tpu.vector_store %arg14[%c0, %c0_0], %0 {strides = array<i32>} : memref<8x128xf32, #tpu.memory_space<vmem>>, vector<8x128xf32>,
    %c4_i32 = arith.constant 4 : i32
    %2 = arith.muli %arg0, %c4_i32 : i32
    %3 = arith.index_cast %arg0 : i32 to index
    %4 = memref.load %arg1[%3] : memref<3xi32, #tpu.memory_space<smem>>
    %c0_i32 = arith.constant 0 : i32
    %c0_i32_1 = arith.constant 0 : i32
    %5 = arith.subi %4, %c0_i32_1 : i32
    %6 = arith.addi %c0_i32_1, %5 : i32
    %c1_i32 = arith.constant 1 : i32
    scf.for %arg15 = %c0_i32_1 to %6 step %c1_i32  : i32 {
      %40 = arith.addi %2, %arg15 : i32
      %41 = arith.index_cast %40 : i32 to index
      %42 = memref.load %arg2[%41] : memref<12xi32, #tpu.memory_space<smem>>
      %43 = arith.addi %2, %arg15 : i32
      %44 = arith.index_cast %43 : i32 to index
      %45 = memref.load %arg3[%44] : memref<12xi32, #tpu.memory_space<smem>>
      %46 = arith.index_cast %42 : i32 to index
      %c0_30 = arith.constant 0 : index
      %47 = vector.load %arg14[%46, %c0_30] : memref<8x128xf32, #tpu.memory_space<vmem>>, vector<1x128xf32>
      %48 = arith.index_cast %45 : i32 to index
      %c0_31 = arith.constant 0 : index
      %49 = vector.load %arg13[%48, %c0_31] : memref<24x128xf32, #tpu.memory_space<vmem>>, vector<1x128xf32>
      %50 = arith.addf %47, %49 : vector<1x128xf32>
      %51 = arith.index_cast %42 : i32 to index
      %c0_32 = arith.constant 0 : index
      %52 = vector.load %arg14[%51, %c0_32] : memref<8x128xf32, #tpu.memory_space<vmem>>, vector<1x128xf32>
      tpu.vector_store %arg14[%51, %c0_32], %50 {strides = array<i32>} : memref<8x128xf32, #tpu.memory_space<vmem>>, vector<1x128xf32>,
    }
    %c0_2 = arith.constant 0 : index
    %c0_3 = arith.constant 0 : index
    %c0_4 = arith.constant 0 : index
    %7 = vector.load %arg4[%c0_2, %c0_3, %c0_4] : memref<1x8x128xf32, #tpu.memory_space<vmem>>, vector<1x8x128xf32>
    %8 = vector.shape_cast %7 : vector<1x8x128xf32> to vector<8x128xf32>
    %c0_5 = arith.constant 0 : index
    %c0_6 = arith.constant 0 : index
    %9 = vector.load %arg7[%c0_5, %c0_6] : memref<128x128xf32, #tpu.memory_space<vmem>>, vector<128x128xf32>
    %cst_7 = arith.constant dense<0.000000e+00> : vector<8x128xf32>
    %10 = tpu.matmul %8, %9, %cst_7 {dimension_numbers = #tpu.dot_dimension_numbers<[1], [0], [0], [1], [0, 0, 1, 1], [], []>} : vector<8x128xf32>, vector<128x128xf32>, vector<8x128xf32> -> vector<8x128xf32>
    %c0_8 = arith.constant 0 : index
    %c0_9 = arith.constant 0 : index
    %11 = vector.load %arg8[%c0_8, %c0_9] : memref<1x128xf32, #tpu.memory_space<vmem>>, vector<1x128xf32>
    %12 = vector.broadcast %11 : vector<1x128xf32> to vector<8x128xf32>
    %13 = arith.addf %10, %12 : vector<8x128xf32>
    %cst_10 = arith.constant 0.000000e+00 : f32
    %14 = vector.broadcast %cst_10 : f32 to vector<8x128xf32>
    %15 = arith.maximumf %13, %14 : vector<8x128xf32>
    %c0_11 = arith.constant 0 : index
    %c0_12 = arith.constant 0 : index
    %c0_13 = arith.constant 0 : index
    %16 = vector.load %arg5[%c0_11, %c0_12, %c0_13] : memref<1x8x1xf32, #tpu.memory_space<vmem>>, vector<1x8x1xf32>
    %17 = vector.shape_cast %16 : vector<1x8x1xf32> to vector<8x1xf32>
    %18 = vector.broadcast %17 : vector<8x1xf32> to vector<8x128xf32>
    %19 = arith.mulf %15, %18 : vector<8x128xf32>
    %c0_14 = arith.constant 0 : index
    %c0_15 = arith.constant 0 : index
    %20 = vector.load %arg9[%c0_14, %c0_15] : memref<128x128xf32, #tpu.memory_space<vmem>>, vector<128x128xf32>
    %cst_16 = arith.constant dense<0.000000e+00> : vector<8x128xf32>
    %21 = tpu.matmul %19, %20, %cst_16 {dimension_numbers = #tpu.dot_dimension_numbers<[1], [0], [0], [1], [0, 0, 1, 1], [], []>} : vector<8x128xf32>, vector<128x128xf32>, vector<8x128xf32> -> vector<8x128xf32>
    %c0_17 = arith.constant 0 : index
    %c0_18 = arith.constant 0 : index
    %22 = vector.load %arg10[%c0_17, %c0_18] : memref<1x128xf32, #tpu.memory_space<vmem>>, vector<1x128xf32>
    %23 = vector.broadcast %22 : vector<1x128xf32> to vector<8x128xf32>
    %24 = arith.addf %21, %23 : vector<8x128xf32>
    %c0_19 = arith.constant 0 : index
    %c0_20 = arith.constant 0 : index
    %25 = vector.load %arg14[%c0_19, %c0_20] : memref<8x128xf32, #tpu.memory_space<vmem>>, vector<8x128xf32>
    %c0_21 = arith.constant 0 : index
    %c0_22 = arith.constant 0 : index
    %26 = vector.load %arg11[%c0_21, %c0_22] : memref<128x128xf32, #tpu.memory_space<vmem>>, vector<128x128xf32>
    %cst_23 = arith.constant dense<0.000000e+00> : vector<8x128xf32>
    %27 = tpu.matmul %25, %26, %cst_23 {dimension_numbers = #tpu.dot_dimension_numbers<[1], [0], [0], [1], [0, 0, 1, 1], [], []>} : vector<8x128xf32>, vector<128x128xf32>, vector<8x128xf32> -> vector<8x128xf32>
    %28 = arith.addf %24, %27 : vector<8x128xf32>
    %c0_24 = arith.constant 0 : index
    %c0_25 = arith.constant 0 : index
    %c0_26 = arith.constant 0 : index
    %29 = vector.load %arg6[%c0_24, %c0_25, %c0_26] : memref<1x8x1xf32, #tpu.memory_space<vmem>>, vector<1x8x1xf32>
    %30 = vector.shape_cast %29 : vector<1x8x1xf32> to vector<8x1xf32>
    %c0_27 = arith.constant 0 : index
    %c0_28 = arith.constant 0 : index
    %31 = vector.load %arg12[%c0_27, %c0_28] : memref<1x128xf32, #tpu.memory_space<vmem>>, vector<1x128xf32>
    %32 = vector.broadcast %30 : vector<8x1xf32> to vector<8x128xf32>
    %33 = vector.broadcast %31 : vector<1x128xf32> to vector<8x128xf32>
    %34 = arith.mulf %32, %33 : vector<8x128xf32>
    %35 = arith.addf %28, %34 : vector<8x128xf32>
    %c8_i32 = arith.constant 8 : i32
    %36 = arith.muli %arg0, %c8_i32 : i32
    %37 = tpu.assume_multiple %36, 8 : i32
    %38 = arith.index_cast %37 : i32 to index
    %c0_29 = arith.constant 0 : index
    %39 = vector.load %arg13[%38, %c0_29] : memref<24x128xf32, #tpu.memory_space<vmem>>, vector<8x128xf32>
    tpu.vector_store %arg13[%38, %c0_29], %35 {strides = array<i32>} : memref<24x128xf32, #tpu.memory_space<vmem>>, vector<8x128xf32>,
    return
  }
  func.func @transform_0(%arg0: i32, %arg1: memref<3xi32, #tpu.memory_space<smem>>, %arg2: memref<12xi32, #tpu.memory_space<smem>>, %arg3: memref<12xi32, #tpu.memory_space<smem>>) -> (i32, i32, i32) {
    %c0_i32 = arith.constant 0 : i32
    %c0_i32_0 = arith.constant 0 : i32
    %c0_i32_1 = arith.constant 0 : i32
    return %arg0, %c0_i32, %c0_i32_0 : i32, i32, i32
  }
  func.func @transform_1(%arg0: i32, %arg1: memref<3xi32, #tpu.memory_space<smem>>, %arg2: memref<12xi32, #tpu.memory_space<smem>>, %arg3: memref<12xi32, #tpu.memory_space<smem>>) -> (i32, i32, i32) {
    %c0_i32 = arith.constant 0 : i32
    %c0_i32_0 = arith.constant 0 : i32
    %c0_i32_1 = arith.constant 0 : i32
    return %arg0, %c0_i32, %c0_i32_0 : i32, i32, i32
  }
  func.func @transform_2(%arg0: i32, %arg1: memref<3xi32, #tpu.memory_space<smem>>, %arg2: memref<12xi32, #tpu.memory_space<smem>>, %arg3: memref<12xi32, #tpu.memory_space<smem>>) -> (i32, i32, i32) {
    %c0_i32 = arith.constant 0 : i32
    %c0_i32_0 = arith.constant 0 : i32
    %c0_i32_1 = arith.constant 0 : i32
    return %arg0, %c0_i32, %c0_i32_0 : i32, i32, i32
  }
  func.func @transform_3(%arg0: i32, %arg1: memref<3xi32, #tpu.memory_space<smem>>, %arg2: memref<12xi32, #tpu.memory_space<smem>>, %arg3: memref<12xi32, #tpu.memory_space<smem>>) -> (i32, i32) {
    %c0_i32 = arith.constant 0 : i32
    %c0_i32_0 = arith.constant 0 : i32
    %c0_i32_1 = arith.constant 0 : i32
    return %c0_i32, %c0_i32_0 : i32, i32
  }
  func.func @transform_4(%arg0: i32, %arg1: memref<3xi32, #tpu.memory_space<smem>>, %arg2: memref<12xi32, #tpu.memory_space<smem>>, %arg3: memref<12xi32, #tpu.memory_space<smem>>) -> (i32, i32) {
    %c0_i32 = arith.constant 0 : i32
    %c0_i32_0 = arith.constant 0 : i32
    %c0_i32_1 = arith.constant 0 : i32
    return %c0_i32, %c0_i32_0 : i32, i32
  }
  func.func @transform_5(%arg0: i32, %arg1: memref<3xi32, #tpu.memory_space<smem>>, %arg2: memref<12xi32, #tpu.memory_space<smem>>, %arg3: memref<12xi32, #tpu.memory_space<smem>>) -> (i32, i32) {
    %c0_i32 = arith.constant 0 : i32
    %c0_i32_0 = arith.constant 0 : i32
    %c0_i32_1 = arith.constant 0 : i32
    return %c0_i32, %c0_i32_0 : i32, i32
  }
  func.func @transform_6(%arg0: i32, %arg1: memref<3xi32, #tpu.memory_space<smem>>, %arg2: memref<12xi32, #tpu.memory_space<smem>>, %arg3: memref<12xi32, #tpu.memory_space<smem>>) -> (i32, i32) {
    %c0_i32 = arith.constant 0 : i32
    %c0_i32_0 = arith.constant 0 : i32
    %c0_i32_1 = arith.constant 0 : i32
    return %c0_i32, %c0_i32_0 : i32, i32
  }
  func.func @transform_7(%arg0: i32, %arg1: memref<3xi32, #tpu.memory_space<smem>>, %arg2: memref<12xi32, #tpu.memory_space<smem>>, %arg3: memref<12xi32, #tpu.memory_space<smem>>) -> (i32, i32) {
    %c0_i32 = arith.constant 0 : i32
    %c0_i32_0 = arith.constant 0 : i32
    %c0_i32_1 = arith.constant 0 : i32
    return %c0_i32, %c0_i32_0 : i32, i32
  }
  func.func @transform_8(%arg0: i32, %arg1: memref<3xi32, #tpu.memory_space<smem>>, %arg2: memref<12xi32, #tpu.memory_space<smem>>, %arg3: memref<12xi32, #tpu.memory_space<smem>>) -> (i32, i32) {
    %c0_i32 = arith.constant 0 : i32
    %c0_i32_0 = arith.constant 0 : i32
    %c0_i32_1 = arith.constant 0 : i32
    return %c0_i32, %c0_i32_0 : i32, i32
  }
  func.func @transform_9(%arg0: i32, %arg1: memref<3xi32, #tpu.memory_space<smem>>, %arg2: memref<12xi32, #tpu.memory_space<smem>>, %arg3: memref<12xi32, #tpu.memory_space<smem>>) -> (i32, i32) {
    %c0_i32 = arith.constant 0 : i32
    %c0_i32_0 = arith.constant 0 : i32
    %c0_i32_1 = arith.constant 0 : i32
    return %c0_i32, %c0_i32_0 : i32, i32
  }
}

</mosaic_0001>

<bundles_post_ra>
// kernel: tpu_custom_call.1
= control target key start
LH: loop header
LB: loop body
LE: loop exit
PB: predicated region body
PF: predicated region fallthrough
CT: control target
= control target key end

     0   :  { %s1640_s0 = inlined_call_operand.vmem [shape: s32[3], index: 0, kind: input, shape index: {}]   ;;  %s1641_s3 = inlined_call_operand.vmem [shape: f32[3,8,128], index: 3, kind: input, shape index: {}]   ;;  %s1642_s4 = inlined_call_operand.vmem [shape: f32[3,8,1], index: 4, kind: input, shape index: {}]   ;;  %s1643_s5 = inlined_call_operand.vmem [shape: f32[3,8,1], index: 5, kind: input, shape index: {}]   ;;  %s1644_s6 = inlined_call_operand.hbm [shape: f32[128,128], index: 6, kind: input, shape index: {}]   ;;  %s1645_s7 = inlined_call_operand.vmem [shape: f32[1,128], index: 7, kind: input, shape index: {}]   ;;  %s1646_s8 = inlined_call_operand.hbm [shape: f32[128,128], index: 8, kind: input, shape index: {}]   ;;  %s1647_s9 = inlined_call_operand.vmem [shape: f32[1,128], index: 9, kind: input, shape index: {}]   ;;  %s1648_s10 = inlined_call_operand.hbm [shape: f32[128,128], index: 10, kind: input, shape index: {}]   ;;  %s1649_s11 = inlined_call_operand.vmem [shape: f32[1,128], index: 11, kind: input, shape index: {}]   ;;  %s1650_s12 = inlined_call_operand.hbm [shape: f32[24,128], index: 12, kind: output, shape index: {}]   ;;  %s1651_s1 = inlined_call_operand.vmem [shape: s32[12], index: 1, kind: input, shape index: {}]   ;;  %s1652_s2 = inlined_call_operand.vmem [shape: s32[12], index: 2, kind: input, shape index: {}]  }
   0x1   :  { %s17_s23 = sshll.u32 %s1640_s0, 4  ;;  %s21_s26 = sshll.u32 %s1651_s1, 4  ;;  %s18_s23 = int_to_ptr.vmem [resolvable:$true] %s17_s23  ;;  %s22_s26 = int_to_ptr.vmem [resolvable:$true] %s21_s26 }
   0x2   :  { %s1159_s27 = scalar_lea.vmem %s18_s23, 16  ;;  %p1164_p1 = scmp.lt.s32.totalorder %s18_s23, %s18_s23 }
   0x3   :  { %p1160_p0 = scmp.ne.s32.totalorder %s18_s23, %s1159_s27  ;;  %p1165_p2 = scmp.lt.s32.totalorder %s1159_s27, %s1159_s27 }
   0x5   :  { %p1166_p3 = por %p1165_p2, %p1164_p1 }
   0x7   :  { %p1167_p4 = pnand %p1166_p3, %p1160_p0 }
   0x9   :  { %1170 = shalt.err (!%p1167_p4)  }
   0xa   :  { %s1335_s28 = smov [#allocation4]   ;;  %s1171_s29 = scalar_lea.vmem %s22_s26, 16 }
   0xb   :  { %20 = dma.vmem_to_smem %s18_s23, 16, %s1335_s28, [#allocation3] }
   0xc   :  { %p1172_p5 = scmp.ne.s32.totalorder %s22_s26, %s1171_s29  ;;  %p1176_p6 = scmp.lt.s32.totalorder %s22_s26, %s22_s26 }
   0xd   :  { %p1177_p7 = scmp.lt.s32.totalorder %s1171_s29, %s1171_s29 }
   0xf   :  { %p1178_p8 = por %p1177_p7, %p1176_p6 }
  0x11   :  { %p1179_p9 = pnand %p1178_p8, %p1172_p5 }
  0x13   :  { %1182 = shalt.err (!%p1179_p9)  }
  0x14   :  { %s1336_s0 = smov [#allocation5]   ;;  %s25_s13 = sshll.u32 %s1652_s2, 4  ;;  %s26_s13 = int_to_ptr.vmem [resolvable:$true] %s25_s13 }
  0x15   :  { %24 = dma.vmem_to_smem %s22_s26, 16, %s1336_s0, [#allocation3] }
  0x16   :  { %s1183_s14 = scalar_lea.vmem %s26_s13, 16  ;;  %p1188_p11 = scmp.lt.s32.totalorder %s26_s13, %s26_s13 }
  0x17   :  { %p1184_p10 = scmp.ne.s32.totalorder %s26_s13, %s1183_s14  ;;  %p1189_p12 = scmp.lt.s32.totalorder %s1183_s14, %s1183_s14 }
  0x19   :  { %p1190_p13 = por %p1189_p12, %p1188_p11 }
  0x1b   :  { %p1191_p0 = pnand %p1190_p13, %p1184_p10 }
  0x1d   :  { %1194 = shalt.err (!%p1191_p0)  }
  0x1e   :  { %s1337_s15 = smov [#allocation6]  }
  0x1f   :  { %28 = dma.vmem_to_smem %s26_s13, 16, %s1337_s15, [#allocation3] }
  0x20   :  { %1313 = dma.done.wait [#allocation3], 48 }
  0x21   :  { %1314 = vsyncadd [#allocation3], 4294967248 }
  0x22   :  { %30 = sfence }
  0x23   :  { %31 = vsyncpa [#allocation8], 0 }
  0x24   :  { %32 = vsyncpa [#allocation11], 0 }
  0x25   :  { %33 = vsyncpa [#allocation9], 0  ;;  %s1424_s16 = smov 0  }
  0x26 LB: > { %s1430_s2 = sadd.s32 4294967295, %s1329_s16   ;;  %p843_p1 = scmp.ge.s32.totalorder %s1329_s16, 1  ;;  %s1329_s16 = sphi %s1424_s16, %s39_s16  }
  0x27   : > { %p269_p2 = scmp.lt.s32.totalorder %s1329_s16, 4  ;;  %p1653_p3 = scmp.eq.s32.totalorder %s1430_s2, 0 }
  0x28   : > { %s1338_s18 = smov [#allocation10]   ;;  %s1339_s20 = smov [#allocation7]  }
  0x29   : > { %p1435_p4 = pnand %p843_p1, %p269_p2  ;;  %s297_s19 = sshll.u32 %s1338_s18, 4  ;;  %s298_s19 = int_to_ptr.vmem [resolvable:$true] %s297_s19 }
  0x2a   : > { %s281_s21 = sshll.u32 %s1339_s20, 4  ;;  %s1340_s23 = smov [#allocation12]   ;;  %s1447_s21 = int_to_ptr.vmem [resolvable:$true] %s281_s21 }
  0x2b   : > { %s1655_s17 = scalar_select %p1435_p4, 1, 0 }
  0x2c   : > { %p1109_p5 = pneg %p1435_p4  ;;  %s313_s24 = sshll.u32 %s1340_s23, 4  ;;  %s1449_s24 = int_to_ptr.vmem [resolvable:$true] %s313_s24 }
  0x2d   : > { %s1195_s27 = scalar_lea.hbm %s1646_s8, 2048 }
  0x2e   : > { %p1443_p6 = pnand %p1653_p3, %p1109_p5  ;;  %p1196_p7 = scmp.ne.s32.totalorder %s1646_s8, %s1195_s27 }
  0x2f   : > { %p1202_p11 = scmp.lt.u32.totalorder %s1195_s27, %s1646_s8 }
  0x30   : > { %p1459_p8 = pneg %p1443_p6 }
  0x32   : > { %p1198_p9 = pnand %p1459_p8, %p1196_p7 }
  0x34   : > { %p1199_p10 = pneg %p1198_p9 }
  0x36   : > { %p1204_p12 = pnand %p1202_p11, %p1199_p10 }
  0x38   : > { %1207 = shalt.err (!%p1204_p12)
}
  0x39   : > { %s1208_s13 = scalar_lea.vmem %s298_s19, 2048  ;;  %p1216_p2 = scmp.lt.s32.totalorder %s298_s19, %s298_s19 }
  0x3a   : > { %p1209_p13 = scmp.ne.s32.totalorder %s298_s19, %s1208_s13  ;;  %p1217_p5 = scmp.lt.s32.totalorder %s1208_s13, %s1208_s13 }
  0x3c   : > { %p1211_p0 = pnand %p1209_p13, %p1459_p8  ;;  %p1218_p3 = por %p1217_p5, %p1216_p2 }
  0x3e   : > { %p1212_p1 = pneg %p1211_p0 }
  0x40   : > { %p1219_p4 = pnand %p1218_p3, %p1212_p1 }
  0x42   : > { %1222 = shalt.err (!%p1219_p4)
}
  0x43   : > { %s1341_s14 = smov 128   ;;  %s1342_s15 = smov 8  }
  0x44   : > { %1115 = dma.hbm_to_vmem [thread:$0]  (!%p1443_p6), %s1646_s8, 2048, %s298_s19, [#allocation11], %s1341_s14, %s1341_s14, %s1342_s15  }
  0x45   : > { %s1223_s26 = scalar_lea.hbm %s1644_s6, 2048 }
  0x46   : > { %p1224_p3 = scmp.ne.s32.totalorder %s1644_s6, %s1223_s26  ;;  %p1230_p9 = scmp.lt.u32.totalorder %s1223_s26, %s1644_s6 }
  0x48   : > { %p1226_p4 = pnand %p1224_p3, %p1459_p8 }
  0x4a   : > { %p1227_p7 = pneg %p1226_p4 }
  0x4c   : > { %p1232_p10 = pnand %p1230_p9, %p1227_p7 }
  0x4e   : > { %1235 = shalt.err (!%p1232_p10)
}
  0x4f   : > { %s1236_s19 = scalar_lea.vmem %s1447_s21, 2048  ;;  %p1244_p0 = scmp.lt.s32.totalorder %s1447_s21, %s1447_s21 }
  0x50   : > { %p1237_p11 = scmp.ne.s32.totalorder %s1447_s21, %s1236_s19  ;;  %p1245_p1 = scmp.lt.s32.totalorder %s1236_s19, %s1236_s19 }
  0x52   : > { %p1239_p12 = pnand %p1237_p11, %p1459_p8  ;;  %p1246_p2 = por %p1245_p1, %p1244_p0 }
  0x54   : > { %p1240_p13 = pneg %p1239_p12 }
  0x56   : > { %p1247_p5 = pnand %p1246_p2, %p1240_p13 }
  0x58   : > { %1250 = shalt.err (!%p1247_p5)
}
  0x59   : > { %1112 = dma.hbm_to_vmem [thread:$0]  (!%p1443_p6), %s1644_s6, 2048, %s1447_s21, [#allocation8], %s1341_s14, %s1341_s14, %s1342_s15  }
  0x5a   : > { %s1251_s23 = scalar_lea.hbm %s1648_s10, 2048 }
  0x5b   : > { %p1252_p3 = scmp.ne.s32.totalorder %s1648_s10, %s1251_s23  ;;  %p1258_p9 = scmp.lt.u32.totalorder %s1251_s23, %s1648_s10 }
  0x5d   : > { %p1254_p4 = pnand %p1252_p3, %p1459_p8 }
  0x5f   : > { %p1255_p7 = pneg %p1254_p4 }
  0x61   : > { %p1260_p10 = pnand %p1258_p9, %p1255_p7 }
  0x63   : > { %1263 = shalt.err (!%p1260_p10)
}
  0x64   : > { %s1264_s21 = scalar_lea.vmem %s1449_s24, 2048  ;;  %p1272_p0 = scmp.lt.s32.totalorder %s1449_s24, %s1449_s24 }
  0x65   : > { %p1265_p11 = scmp.ne.s32.totalorder %s1449_s24, %s1264_s21  ;;  %p1273_p1 = scmp.lt.s32.totalorder %s1264_s21, %s1264_s21 }
  0x67   : > { %p1267_p12 = pnand %p1265_p11, %p1459_p8  ;;  %p1274_p2 = por %p1273_p1, %p1272_p0 }
  0x69   : > { %p1268_p13 = pneg %p1267_p12 }
  0x6b   : > { %p1275_p5 = pnand %p1274_p2, %p1268_p13 }
  0x6d   : > { %1278 = shalt.err (!%p1275_p5)
}
  0x6e   : > { %1118 = dma.hbm_to_vmem [thread:$0]  (!%p1443_p6), %s1648_s10, 2048, %s1449_s24, [#allocation11], %s1341_s14, %s1341_s14, %s1342_s15  }
  0x6f   : > { %p1658_p3 = scmp.ne.s32.totalorder %s1655_s17, 0 }
  0x70   : > { %p1659_p8 = scmp.eq.s32.totalorder (!%p1658_p3), %s1430_s2, 0 }
  0x71   : > { %353 = sbr.rel (%p1658_p3) target bundleno = 640 (0x280), region = 56 }
  0x78   : > { %1316 = dma.done.wait (%p1659_p8), [#allocation8], 2048   ;;  %p1660_p4 = pmov %p1659_p8 }
  0x7a   : > { %1318 = vsyncadd (%p1660_p4), [#allocation8], 4294965248  ;;  %p1661_p7 = pmov %p1660_p4 }
  0x7b   : > { %p1662_p9 = pmov %p1660_p4 }
  0x7c   : > { %1320 = dma.done.wait (%p1661_p7), [#allocation11], 4096  }
  0x7d   : > { %1322 = vsyncadd (%p1662_p9), [#allocation11], 4294963200  ;;  %p399_p6 = scmp.lt.s32.totalorder %s1430_s2, 2  ;;  %s855_s22 = sshll.u32 %s1430_s2, 2  ;;  %v1343_v0 = vmov 0.0  }
  0x7e   : > { %s413_s17 = sld [smem:[#allocation4 + %s1430_s2]]  ;;  %411 = vst [vmem:[#allocation2] sm:$0xff] %v1343_v0 }
  0x7f   : > { %s400_s24 = scalar_select %p399_p6, %s1430_s2, 2 }
  0x81   : > { %s1545_s0 = sshll.u32 %s400_s24, 3 }
  0x82   : > { %s402_s19 = scalar_lea.vmem %s1641_s3, %s1545_s0  ;;  %s406_s18 = scalar_lea.vmem %s1642_s4, %s1545_s0 }
  0x83   : > { %s410_s25 = scalar_lea.vmem %s1643_s5, %s1545_s0 }
  0x84   : > { %p856_p10 = scmp.le.s32.totalorder %s413_s17, 0 }
  0x85   : > { %s1331_s26 = smov (!%p856_p10), 0  }
  0x86   : > { %783 = sbr.rel (%p856_p10) target bundleno = 154 (0x9a), region = 106 }
  0x8d LB: >> { %s420_s27 = sadd.s32 %s1333_s26, %s855_s22  ;;  %s417_s26 = sadd.s32 1, %s1333_s26   ;;  %s1333_s26 = sphi %s1331_s26, %s417_s26  }
  0x8e   : >> { %s421_s28 = sld [smem:[#allocation5 + %s420_s27]]  ;;  %p416_p11 = scmp.ge.s32.totalorder %s417_s26, %s413_s17 }
  0x8f   : >> { %s422_s21 = sld [smem:[#allocation6 + %s420_s27]] }
  0x93   : > { %419 = sbr.rel (!%p416_p11) target bundleno = 141 (0x8d), region = 112 }
  0x94   : >> { %s423_s29 = scalar_lea.vmem [#allocation2], %s421_s28 }
  0x95   : >> { %v424_v1 = vld [vmem:[%s423_s29] sm:$0x1]  ;;  %s425_s1 = scalar_lea.vmem [#allocation13], %s422_s21 }
  0x96   : >> { %v426_v2 = vld [vmem:[%s425_s1] sm:$0x1] }
  0x97   : >> { %v427_v3 = vadd.f32 %v426_v2, %v424_v1 }
  0x99   : >> { %428 = vst [vmem:[%s423_s29] sm:$0x1] %v427_v3 }
  0x9a PF: > { %v430_v4 = vld [vmem:[#allocation7] sm:$0xff]  ;;  %v431_v5 = vld [vmem:[#allocation7 + $0x8] sm:$0xff]  ;;  %v432_v6 = vld [vmem:[#allocation7 + $0x10] sm:$0xff]  ;;  %v1344_v7 = vmov 0.0|0.0   ;;  %vm1345_vm0 = vmmov 0   ;;  %v1346_v10 = vmov 0  }
  0x9b   : > { %1021 = vmatprep.subr.bf16.mxu0 %v1344_v7  ;;  %v1022_v8 = vpack.c.bf16 %v431_v5, %v430_v4  ;;  %v433_v9 = vld [vmem:[#allocation7 + $0x18] sm:$0xff]  ;;  %948 = vmatprep.mubr.msk.f32.mxu0 %vm1345_vm0, %v1343_v0  ;;  %v434_v12 = vld [vmem:[#allocation7 + $0x20] sm:$0xff]  ;;  %v435_v13 = vld [vmem:[#allocation7 + $0x28] sm:$0xff]  ;;  %s1347_s26 = smov [#allocation13]   ;;  %p1125_p12 = scmp.eq.s32.totalorder %s1430_s2, 2 }
  0x9c   : > { %1158 = vset.pattern.permute.xlu0 %v1346_v10  ;;  %1045 = vmatprep.subr.bf16.mxu1 %v1344_v7  ;;  %v1025_v11 = vpack.c.bf16 %v433_v9, %v432_v6  ;;  %v524_v14 = vld [vmem:[%s406_s18] sm:$0xff]  ;;  %v531_v15 = vld [vmem:[#allocation10] sm:$0xff]  ;;  %v532_v16 = vld [vmem:[#allocation10 + $0x8] sm:$0xff]  ;;  %v1028_v17 = vpack.c.bf16 %v435_v13, %v434_v12  ;;  %s736_s27 = sshll.u32 %s1347_s26, 4  ;;  %s737_s27 = int_to_ptr.vmem [resolvable:$true] %s736_s27 }
  0x9d   : > { %1023 = vmatpush3.bf16.msra.mxu0 %v1022_v8  ;;  %983 = vmatprep.mubr.msk.f32.mxu1 %vm1345_vm0, %v1343_v0  ;;  %v712_v18 = vld [vmem:[%s410_s25] sm:$0xff]  ;;  %v1046_v19 = vpack.c.bf16 %v532_v16, %v531_v15  ;;  %v533_v20 = vld [vmem:[#allocation10 + $0x10] sm:$0xff]  ;;  %v535_v25 = vld [vmem:[#allocation10 + $0x20] sm:$0xff]  ;;  %s860_s25 = sshll.u32 %s1430_s2, 3  ;;  %s1279_s21 = scalar_lea.vmem %s737_s27, 384 }
  0x9e   : > { %1024 = vmatprep.subr.bf16.mxu0 %v1344_v7  ;;  %527 = vperm.xlu0 %1158, %v524_v14   ;;  %v436_v21 = vld [vmem:[#allocation7 + $0x30] sm:$0xff]  ;;  %v437_v22 = vld [vmem:[#allocation7 + $0x38] sm:$0xff]  ;;  %v536_v26 = vld [vmem:[#allocation10 + $0x28] sm:$0xff]  ;;  %s728_s28 = scalar_lea.vmem [#allocation13], %s860_s25  ;;  %p1280_p13 = scmp.ne.s32.totalorder %s737_s27, %s1279_s21 }
  0x9f   : > { %v534_v23 = vld [vmem:[#allocation10 + $0x18] sm:$0xff]  ;;  %1047 = vmatpush3.bf16.msra.mxu1 %v1046_v19  ;;  %v1031_v27 = vpack.c.bf16 %v437_v22, %v436_v21  ;;  %v438_v28 = vld [vmem:[#allocation7 + $0x40] sm:$0xff]  ;;  %v439_v29 = vld [vmem:[#allocation7 + $0x48] sm:$0xff]  ;;  %v1052_v30 = vpack.c.bf16 %v536_v26, %v535_v25  ;;  %p1286_p2 = scmp.lt.s32.totalorder %s737_s27, %s737_s27  ;;  %p1287_p5 = scmp.lt.s32.totalorder %s1279_s21, %s1279_s21 }
  0xa0   : > { %v1049_v24 = vpack.c.bf16 %v534_v23, %v533_v20  ;;  %1048 = vmatprep.subr.bf16.mxu1 %v1344_v7  ;;  %v537_v31 = vld [vmem:[#allocation10 + $0x30] sm:$0xff]  ;;  %v538_v32 = vld [vmem:[#allocation10 + $0x38] sm:$0xff]  ;;  %v1034_v33 = vpack.c.bf16 %v439_v29, %v438_v28  ;;  %v539_v37 = vld [vmem:[#allocation10 + $0x40] sm:$0xff]  ;;  %p1281_p0 = pnand %p1280_p13, %p1125_p12 }
  0xa1   : > { %1026 = vmatpush3.bf16.msra.mxu0 %v1025_v11  ;;  %v440_v34 = vld [vmem:[#allocation7 + $0x50] sm:$0xff]  ;;  %v441_v35 = vld [vmem:[#allocation7 + $0x58] sm:$0xff]  ;;  %v1055_v36 = vpack.c.bf16 %v538_v32, %v537_v31  ;;  %v540_v38 = vld [vmem:[#allocation10 + $0x48] sm:$0xff]  ;;  %p1288_p3 = por %p1287_p5, %p1286_p2 }
  0xa2   : > { %1027 = vmatprep.subr.bf16.mxu0 %v1344_v7  ;;  %716 = vperm.xlu0 %1158, %v712_v18   ;;  %v1037_v39 = vpack.c.bf16 %v441_v35, %v440_v34  ;;  %v442_v40 = vld [vmem:[#allocation7 + $0x60] sm:$0xff]  ;;  %v443_v41 = vld [vmem:[#allocation7 + $0x68] sm:$0xff]  ;;  %v1058_v42 = vpack.c.bf16 %v540_v38, %v539_v37  ;;  %v541_v43 = vld [vmem:[#allocation10 + $0x50] sm:$0xff]  ;;  %p1282_p1 = pneg %p1281_p0 }
  0xa3   : > { %1050 = vmatpush3.bf16.msra.mxu1 %v1049_v24  ;;  %v542_v44 = vld [vmem:[#allocation10 + $0x58] sm:$0xff]  ;;  %v1040_v45 = vpack.c.bf16 %v443_v41, %v442_v40  ;;  %v444_v46 = vld [vmem:[#allocation7 + $0x70] sm:$0xff]  ;;  %v625_v50 = vld [vmem:[#allocation12] sm:$0xff] }
  0xa4   : > { %1051 = vmatprep.subr.bf16.mxu1 %v1344_v7  ;;  %v445_v47 = vld [vmem:[#allocation7 + $0x78] sm:$0xff]  ;;  %v1061_v48 = vpack.c.bf16 %v542_v44, %v541_v43  ;;  %v626_v51 = vld [vmem:[#allocation12 + $0x8] sm:$0xff]  ;;  %v627_v54 = vld [vmem:[#allocation12 + $0x10] sm:$0xff]  ;;  %p1289_p8 = pnand %p1288_p3, %p1282_p1 }
  0xa5   : > { %1029 = vmatpush3.bf16.msra.mxu0 %v1028_v17  ;;  %v1043_v49 = vpack.c.bf16 %v445_v47, %v444_v46  ;;  %v429_v52 = vld [vmem:[%s402_s19] sm:$0xff]  ;;  %v1070_v53 = vpack.c.bf16 %v626_v51, %v625_v50  ;;  %v629_v57 = vld [vmem:[#allocation12 + $0x20] sm:$0xff]  ;;  %v630_v58 = vld [vmem:[#allocation12 + $0x28] sm:$0xff] }
  0xa6   : > { %1030 = vmatprep.subr.bf16.mxu0 %v1344_v7  ;;  %v628_v55 = vld [vmem:[#allocation12 + $0x18] sm:$0xff]  ;;  %v1076_v59 = vpack.c.bf16 %v630_v58, %v629_v57  ;;  %v631_v60 = vld [vmem:[#allocation12 + $0x30] sm:$0xff]  ;;  %v633_v63 = vld [vmem:[#allocation12 + $0x40] sm:$0xff] }
  0xa7   : > { %1053 = vmatpush3.bf16.msra.mxu1 %v1052_v30  ;;  %v1073_v56 = vpack.c.bf16 %v628_v55, %v627_v54  ;;  %v632_v61 = vld [vmem:[#allocation12 + $0x38] sm:$0xff]  ;;  %v634_v1 = vld [vmem:[#allocation12 + $0x48] sm:$0xff]  ;;  %v543_v5 = vld [vmem:[#allocation10 + $0x60] sm:$0xff] }
  0xa8   : > { %1054 = vmatprep.subr.bf16.mxu1 %v1344_v7  ;;  %v1079_v62 = vpack.c.bf16 %v632_v61, %v631_v60  ;;  %v1082_v2 = vpack.c.bf16 %v634_v1, %v633_v63  ;;  %v636_v3 = vld [vmem:[#allocation12 + $0x58] sm:$0xff]  ;;  %v544_v6 = vld [vmem:[#allocation10 + $0x68] sm:$0xff]  ;;  %v637_v9 = vld [vmem:[#allocation12 + $0x60] sm:$0xff] }
  0xa9   : > { %1032 = vmatpush3.bf16.msra.mxu0 %v1031_v27  ;;  %v1064_v8 = vpack.c.bf16 %v544_v6, %v543_v5  ;;  %v638_v10 = vld [vmem:[#allocation12 + $0x68] sm:$0xff]  ;;  %v545_v12 = vld [vmem:[#allocation10 + $0x70] sm:$0xff]  ;;  %v546_v13 = vld [vmem:[#allocation10 + $0x78] sm:$0xff] }
  0xaa   : > { %1033 = vmatprep.subr.bf16.mxu0 %v1344_v7  ;;  %v1088_v11 = vpack.c.bf16 %v638_v10, %v637_v9  ;;  %v1067_v14 = vpack.c.bf16 %v546_v13, %v545_v12  ;;  %v639_v15 = vld [vmem:[#allocation12 + $0x70] sm:$0xff]  ;;  %v640_v16 = vld [vmem:[#allocation12 + $0x78] sm:$0xff] }
  0xab   : > { %1056 = vmatpush3.bf16.msra.mxu1 %v1055_v36  ;;  %v1091_v17 = vpack.c.bf16 %v640_v16, %v639_v15  ;;  %v624_v18 = vld [vmem:[#allocation2] sm:$0xff] }
  0xac   : > { %1057 = vmatprep.subr.bf16.mxu1 %v1344_v7  ;;  %v857_v19 = vld [vmem:[%s1645_s7] ss:$0 sm:$0xff] }
  0xad   : > { %1035 = vmatpush3.bf16.msra.mxu0 %v1034_v33  ;;  %v858_v27 = vld [vmem:[%s1647_s9] ss:$0 sm:$0xff] }
  0xae   : > { %1036 = vmatprep.subr.bf16.mxu0 %v1344_v7  ;;  %v859_v28 = vld [vmem:[%s1649_s11] ss:$0 sm:$0xff] }
  0xaf   : > { %1059 = vmatpush3.bf16.msra.mxu1 %v1058_v42 }
  0xb0   : > { %1060 = vmatprep.subr.bf16.mxu1 %v1344_v7 }
  0xb1   : > { %1038 = vmatpush3.bf16.msra.mxu0 %v1037_v39 }
  0xb2   : > { %1039 = vmatprep.subr.bf16.mxu0 %v1344_v7 }
  0xb3   : > { %1062 = vmatpush3.bf16.msra.mxu1 %v1061_v48 }
  0xb4   : > { %1063 = vmatprep.subr.bf16.mxu1 %v1344_v7 }
  0xb5   : > { %1041 = vmatpush3.bf16.msra.mxu0 %v1040_v45 }
  0xb6   : > { %1042 = vmatprep.subr.bf16.mxu0 %v1344_v7 }
  0xb7   : > { %1065 = vmatpush3.bf16.msra.mxu1 %v1064_v8 }
  0xb8   : > { %1066 = vmatprep.subr.bf16.mxu1 %v1344_v7 }
  0xb9   : > { %1044 = vmatpush3.bf16.msra.mxu0 %v1043_v49 }
  0xba   : > { %1069 = vmatprep.subr.bf16.mxu0 %v1344_v7 }
  0xbb   : > { %1068 = vmatpush3.bf16.msra.mxu1 %v1067_v14 }
  0xbc   : > { %949 = vmatmul.mubr.f32.vlgmr.msra.gmra.mrb[0].mxu0 %v429_v52 }
  0xbd   : > { %1071 = vmatpush3.bf16.msra.mxu0 %v1070_v53  ;;  %1018 = vmatprep.mubr.msk.f32.mxu0 %vm1345_vm0, %v1343_v0  ;;  %v635_v0 = vld [vmem:[#allocation12 + $0x50] sm:$0xff] }
  0xbe   : > { %1072 = vmatprep.subr.bf16.mxu0 %v1344_v7  ;;  %v1085_v4 = vpack.c.bf16 %v636_v3, %v635_v0 }
  0xc1   : > { %1074 = vmatpush3.bf16.msra.mxu0 %v1073_v56 }
  0xc2   : > { %1075 = vmatprep.subr.bf16.mxu0 %v1344_v7 }
  0xc5   : > { %1077 = vmatpush3.bf16.msra.mxu0 %v1076_v59 }
  0xc6   : > { %1078 = vmatprep.subr.bf16.mxu0 %v1344_v7 }
  0xc9   : > { %1080 = vmatpush3.bf16.msra.mxu0 %v1079_v62 }
  0xca   : > { %1081 = vmatprep.subr.bf16.mxu0 %v1344_v7 }
  0xcd   : > { %1083 = vmatpush3.bf16.msra.mxu0 %v1082_v2 }
  0xce   : > { %1084 = vmatprep.subr.bf16.mxu0 %v1344_v7 }
  0xd1   : > { %1086 = vmatpush3.bf16.msra.mxu0 %v1085_v4 }
  0xd2   : > { %1087 = vmatprep.subr.bf16.mxu0 %v1344_v7 }
  0xd5   : > { %1089 = vmatpush3.bf16.msra.mxu0 %v1088_v11 }
  0xd6   : > { %1090 = vmatprep.subr.bf16.mxu0 %v1344_v7 }
  0xd9   : > { %1092 = vmatpush3.bf16.msra.mxu0 %v1091_v17 }
  0xdc   : > { %1019 = vmatmul.mubr.f32.vlgmr.msra.gmra.mrb[2].mxu0 %v624_v18 }
 0x11d   : > { %v528_v24 = vpop.permute.xlu0 %527 }
 0x121   : > { %v717_v29 = vpop.permute.xlu0 %716 }
 0x122   : > { %v725_v33 = vmul.f32 %v859_v28, %v717_v29 }
 0x18f   : > { %v519_v20 = vpop.f32.mrb[0].mxu0 }
 0x190   : > { %v520_v21 = vadd.f32 %v857_v19, %v519_v20  ;;  %v950_v22 = vpop.f32.mrb[1].mxu0 }
 0x192   : > { %v523_v23 = vmax.f32 %v520_v21, 0.0 }
 0x194   : > { %v530_v25 = vmul.f32 %v528_v24, %v523_v23 }
 0x196   : > { %984 = vmatmul.mubr.f32.vlgmr.msra.gmra.mrb[0].mxu1 %v530_v25 }
 0x1af   : > { %v707_v7 = vpop.f32.mrb[2].mxu0 }
 0x1b0   : > { %v1020_v26 = vpop.f32.mrb[3].mxu0 }
 0x269   : > { %v620_v30 = vpop.f32.mrb[0].mxu1 }
 0x26a   : > { %v621_v31 = vadd.f32 %v858_v27, %v620_v30  ;;  %v985_v32 = vpop.f32.mrb[1].mxu1 }
 0x26c   : > { %v711_v34 = vadd.f32 %v707_v7, %v621_v31 }
 0x26e   : > { %v726_v35 = vadd.f32 %v725_v33, %v711_v34 }
 0x270   : > { %729 = vst [vmem:[%s728_s28] sm:$0xff] %v726_v35 }
 0x271   : > { %1292 = shalt.err (!%p1289_p8)
}
 0x272   : > { %s1293_s22 = scalar_lea.hbm %s1650_s12, 384 }
 0x273   : > { %p1294_p4 = scmp.ne.s32.totalorder %s1650_s12, %s1293_s22  ;;  %p1299_p6 = scmp.lt.u32.totalorder %s1293_s22, %s1650_s12 }
 0x275   : > { %p1295_p7 = pnand %p1294_p4, %p1125_p12 }
 0x277   : > { %p1296_p9 = pneg %p1295_p7 }
 0x279   : > { %p1301_p10 = pnand %p1299_p6, %p1296_p9 }
 0x27b   : > { %1304 = shalt.err (!%p1301_p10)
}
 0x27c   : > { %s1348_s30 = smov 128   ;;  %s1349_s0 = smov 8  }
 0x27d   : > { %1106 = dma.vmem_to_hbm [thread:$0]  (%p1125_p12), %s737_s27, 384, %s1650_s12, [#allocation9], %s1348_s30, %s1348_s30, %s1349_s0  }
 0x27e   : > { %1324 = dma.done.wait (%p1125_p12), [#allocation9], 384  }
 0x27f   : > { %1326 = vsyncadd (%p1125_p12), [#allocation9], 4294966912 }
 0x280 PF: > { %s39_s16 = sadd.s32 1, %s1329_s16  }
 0x281   : > { %p36_p11 = scmp.ge.s32.totalorder %s39_s16, 5  }
 0x283   :  { %38 = sbr.rel (!%p36_p11) target bundleno = 38 (0x26), region = 123 }
 0x28a   :  { %752 = vsyncpa [#allocation8], 1 }
 0x28b   :  { %754 = vsyncpa [#allocation8 + $0x1], 1 }
 0x28c   :  { %755 = vsyncpa [#allocation11], 1 }
 0x28d   :  { %756 = vsyncpa [#allocation9], 1 }
 0x28e   :  { %758 = vsyncpa [#allocation9 + $0x1], 1 }

</bundles_post_ra>
